<compile_context>
chip_gen: v5e
topology: v5e:2x2
jax: 0.10.0
libtpu: 0.0.40
codegen_flags: <defaults>
</compile_context>

<pallas_src>
import jax
import jax.numpy as jnp
from jax import lax
from jax.experimental import pallas as pl
from jax.experimental.pallas import tpu as pltpu


def _conv3x3_bn_relu_kernel(x_ref, w_ref, b_ref, o_ref):
    # x_ref: (1, 1, tile_h + 2, (W+2)*Cin)   bf16, halo'd, lane-packed input rows
    # w_ref: (3, (W+2)*Cin, W*Cout)          bf16, BN-scale-folded band weights
    # b_ref: (1, W*Cout)                     f32, folded BN bias (tiled per output col)
    # o_ref: (1, 1, tile_h, W*Cout)          f32
    tile_h = o_ref.shape[2]
    wc = o_ref.shape[3]

    acc = jnp.zeros((tile_h, wc), dtype=jnp.float32)
    # 3 banded matmuls (one per ky tap); kx and Cin are folded into the K dimension
    # of the band matrix, so no strided window copies are materialized.
    for ky in range(3):
        acc = acc + jnp.dot(x_ref[0, 0, ky:ky + tile_h, :], w_ref[ky],
                            preferred_element_type=jnp.float32)

    y = jnp.maximum(acc + b_ref[...], 0.0)          # fused BN bias + ReLU (f32)
    o_ref[...] = y.reshape(o_ref.shape).astype(o_ref.dtype)


def conv3x3_forward(x_nchw, weight_oihw, conv_bias, gamma, beta,
                    running_mean, running_var, eps=1e-5, tile_h=8):
    """conv3x3 forward: Conv2d(3x3, s1, p1) + BatchNorm2d(eval) + ReLU.

    x_nchw:      (N, Cin, H, W)  float32
    weight_oihw: (Cout, Cin, 3, 3)
    returns:     (N, Cout, H, W) float32
    """
    N, Cin, H, W = x_nchw.shape
    Cout = weight_oihw.shape[0]
    if H % tile_h != 0:
        tile_h = H
    n_ht = H // tile_h
    wcin = (W + 2) * Cin           # lane-packed padded row length
    wc = W * Cout                  # lane-dense output row length (128 for toy shape)

    # ---- BN folding (eval mode) + band-weight construction (wrapper, tiny) ----
    scale = gamma / jnp.sqrt(running_var + eps)                    # (Cout,)
    bias = (conv_bias - running_mean) * scale + beta               # (Cout,)
    w_hwio = jnp.transpose(weight_oihw, (2, 3, 1, 0)) * scale      # scale folded in
    # shift[kx][i, j] = 1 iff i == j + kx  -> places tap kx on the right diagonal band
    shift = jnp.stack([jnp.eye(W + 2, W, k=-kx, dtype=w_hwio.dtype)
                       for kx in range(3)], axis=0)                # (3, W+2, W)
    # w_band[ky, (w+kx)*Cin + ci, w*Cout + co] = w_hwio[ky, kx, ci, co] * scale[co]
    w_band = jnp.einsum("xrw,yxio->yriwo", shift, w_hwio).reshape(3, wcin, wc)
    w_band = w_band.astype(jnp.bfloat16)
    bias_row = jnp.tile(bias, W).reshape(1, wc).astype(jnp.float32)

    # ---- input: NCHW -> NHWC, pad by 1, lane-pack, split H into halo'd tiles ----
    x_nhwc = jnp.transpose(x_nchw, (0, 2, 3, 1))                   # (N, H, W, Cin)
    x_pad = jnp.pad(x_nhwc, ((0, 0), (1, 1), (1, 1), (0, 0)))      # (N, H+2, W+2, Cin)
    x_lane = x_pad.reshape(N, H + 2, wcin).astype(jnp.bfloat16)    # bf16 HBM traffic
    x_tiles = jnp.stack([x_lane[:, t * tile_h: t * tile_h + tile_h + 2, :]
                         for t in range(n_ht)], axis=1)            # (N, nH, tile_h+2, wcin)

    out = pl.pallas_call(
        _conv3x3_bn_relu_kernel,
        out_shape=jax.ShapeDtypeStruct((N, n_ht, tile_h, wc), jnp.float32),
        grid_spec=pltpu.PrefetchScalarGridSpec(
            num_scalar_prefetch=0,
            grid=(N, n_ht),
            in_specs=[
                pl.BlockSpec((1, 1, tile_h + 2, wcin), lambda n, t: (n, t, 0, 0)),
                pl.BlockSpec((3, wcin, wc), lambda n, t: (0, 0, 0)),
                pl.BlockSpec((1, wc), lambda n, t: (0, 0)),
            ],
            out_specs=pl.BlockSpec((1, 1, tile_h, wc), lambda n, t: (n, t, 0, 0)),
        ),
        compiler_params=pltpu.CompilerParams(
            dimension_semantics=("parallel", "parallel"),
            vmem_limit_bytes=32 * 1024 * 1024),
    )(x_tiles, w_band, bias_row)

    out = out.reshape(N, H, W, Cout)
    return jnp.transpose(out, (0, 3, 1, 2))                        # back to NCHW


def _reference_forward(x_nchw, weight_oihw, conv_bias, gamma, beta,
                       running_mean, running_var, eps=1e-5, quant_dtype=None):
    # Pure-JAX reference (optionally with the same bf16 input/weight quantization
    # as the kernel, to allow a tight tolerance check).
    scale = gamma / jnp.sqrt(running_var + eps)
    bias = (conv_bias - running_mean) * scale + beta
    w_hwio = jnp.transpose(weight_oihw, (2, 3, 1, 0)) * scale
    x_nhwc = jnp.transpose(x_nchw, (0, 2, 3, 1))
    if quant_dtype is not None:
        x_nhwc = x_nhwc.astype(quant_dtype).astype(jnp.float32)
        w_hwio = w_hwio.astype(quant_dtype).astype(jnp.float32)
    y = lax.conv_general_dilated(
        x_nhwc, w_hwio, window_strides=(1, 1), padding="SAME",
        dimension_numbers=("NHWC", "HWIO", "NHWC"))
    y = jnp.maximum(y + bias, 0.0)
    return jnp.transpose(y, (0, 3, 1, 2))


if __name__ == "__main__":
    # Small shapes consistent with the module: batch=2, in_ch=4, out_ch=8, spatial=16.
    N, Cin, Cout, H, W = 2, 4, 8, 16, 16

    key = jax.random.PRNGKey(0)
    kx, kw, kb, kg, kbe, krm, krv = jax.random.split(key, 7)

    x = jax.random.normal(kx, (N, Cin, H, W), dtype=jnp.float32)
    weight = jax.random.normal(kw, (Cout, Cin, 3, 3), dtype=jnp.float32) * 0.1
    conv_bias = jax.random.normal(kb, (Cout,), dtype=jnp.float32) * 0.1
    gamma = 1.0 + 0.1 * jax.random.normal(kg, (Cout,), dtype=jnp.float32)
    beta = 0.1 * jax.random.normal(kbe, (Cout,), dtype=jnp.float32)
    running_mean = 0.1 * jax.random.normal(krm, (Cout,), dtype=jnp.float32)
    running_var = jnp.abs(1.0 + 0.1 * jax.random.normal(krv, (Cout,), dtype=jnp.float32))

    out = conv3x3_forward(x, weight, conv_bias, gamma, beta,
                          running_mean, running_var)
    out = jax.block_until_ready(out)
    assert out.shape == (N, Cout, H, W)

    # Tight check vs a reference using the same bf16 input/weight quantization.
    ref_q = _reference_forward(x, weight, conv_bias, gamma, beta,
                               running_mean, running_var, quant_dtype=jnp.bfloat16)
    assert jnp.allclose(out, ref_q, atol=1e-3, rtol=1e-3), "mismatch vs bf16 reference"

    # Loose sanity check vs the full-f32 module semantics (bf16 quantization noise only).
    ref_f = _reference_forward(x, weight, conv_bias, gamma, beta,
                               running_mean, running_var)
    assert jnp.allclose(out, ref_f, atol=1e-1, rtol=1e-1), "mismatch vs f32 reference"

    print("KERNEL_OK")
</pallas_src>

<mosaic_0001>
module attributes {stable_mosaic.version = 11 : i64} {
  func.func @_conv3x3_bn_relu_kernel(%arg0: i32, %arg1: i32, %arg2: memref<1x1x10x72xbf16, #tpu.memory_space<vmem>>, %arg3: memref<3x72x128xbf16, #tpu.memory_space<vmem>>, %arg4: memref<1x128xf32, #tpu.memory_space<vmem>>, %arg5: memref<1x1x8x128xf32, #tpu.memory_space<vmem>>) attributes {dimension_semantics = [#tpu.dimension_semantics<parallel>, #tpu.dimension_semantics<parallel>], iteration_bounds = array<i64: 2, 2>, scalar_prefetch = 0 : i64, scratch_operands = 0 : i64, tpu.core_type = #tpu.core_type<tc>, window_params = [{transform_indices = @transform_0, window_bounds = array<i64: 1, 1, 10, 72>}, {pipeline_mode = #tpu.pipeline_mode<synchronous>, transform_indices = @transform_1, window_bounds = array<i64: 3, 72, 128>}, {pipeline_mode = #tpu.pipeline_mode<synchronous>, transform_indices = @transform_2, window_bounds = array<i64: 1, 128>}, {transform_indices = @transform_3, window_bounds = array<i64: 1, 1, 8, 128>}]} {
    %cst = arith.constant 0.000000e+00 : f32
    %0 = vector.broadcast %cst : f32 to vector<8x128xf32>
    %c0 = arith.constant 0 : index
    %c0_0 = arith.constant 0 : index
    %c0_1 = arith.constant 0 : index
    %c0_2 = arith.constant 0 : index
    %1 = vector.load %arg2[%c0, %c0_0, %c0_1, %c0_2] : memref<1x1x10x72xbf16, #tpu.memory_space<vmem>>, vector<1x1x8x72xbf16>
    %2 = vector.shape_cast %1 : vector<1x1x8x72xbf16> to vector<8x72xbf16>
    %c0_3 = arith.constant 0 : index
    %c0_4 = arith.constant 0 : index
    %c0_5 = arith.constant 0 : index
    %3 = vector.load %arg3[%c0_3, %c0_4, %c0_5] : memref<3x72x128xbf16, #tpu.memory_space<vmem>>, vector<1x72x128xbf16>
    %4 = vector.shape_cast %3 : vector<1x72x128xbf16> to vector<72x128xbf16>
    %cst_6 = arith.constant dense<0.000000e+00> : vector<8x128xf32>
    %5 = tpu.matmul %2, %4, %cst_6 {dimension_numbers = #tpu.dot_dimension_numbers<[1], [0], [0], [1], [0, 0, 1, 1], [], []>} : vector<8x72xbf16>, vector<72x128xbf16>, vector<8x128xf32> -> vector<8x128xf32>
    %6 = arith.addf %0, %5 : vector<8x128xf32>
    %c0_7 = arith.constant 0 : index
    %c0_8 = arith.constant 0 : index
    %c1 = arith.constant 1 : index
    %c0_9 = arith.constant 0 : index
    %7 = vector.load %arg2[%c0_7, %c0_8, %c1, %c0_9] : memref<1x1x10x72xbf16, #tpu.memory_space<vmem>>, vector<1x1x8x72xbf16>
    %8 = vector.shape_cast %7 : vector<1x1x8x72xbf16> to vector<8x72xbf16>
    %c1_10 = arith.constant 1 : index
    %c0_11 = arith.constant 0 : index
    %c0_12 = arith.constant 0 : index
    %9 = vector.load %arg3[%c1_10, %c0_11, %c0_12] : memref<3x72x128xbf16, #tpu.memory_space<vmem>>, vector<1x72x128xbf16>
    %10 = vector.shape_cast %9 : vector<1x72x128xbf16> to vector<72x128xbf16>
    %cst_13 = arith.constant dense<0.000000e+00> : vector<8x128xf32>
    %11 = tpu.matmul %8, %10, %cst_13 {dimension_numbers = #tpu.dot_dimension_numbers<[1], [0], [0], [1], [0, 0, 1, 1], [], []>} : vector<8x72xbf16>, vector<72x128xbf16>, vector<8x128xf32> -> vector<8x128xf32>
    %12 = arith.addf %6, %11 : vector<8x128xf32>
    %c0_14 = arith.constant 0 : index
    %c0_15 = arith.constant 0 : index
    %c2 = arith.constant 2 : index
    %c0_16 = arith.constant 0 : index
    %13 = vector.load %arg2[%c0_14, %c0_15, %c2, %c0_16] : memref<1x1x10x72xbf16, #tpu.memory_space<vmem>>, vector<1x1x8x72xbf16>
    %14 = vector.shape_cast %13 : vector<1x1x8x72xbf16> to vector<8x72xbf16>
    %c2_17 = arith.constant 2 : index
    %c0_18 = arith.constant 0 : index
    %c0_19 = arith.constant 0 : index
    %15 = vector.load %arg3[%c2_17, %c0_18, %c0_19] : memref<3x72x128xbf16, #tpu.memory_space<vmem>>, vector<1x72x128xbf16>
    %16 = vector.shape_cast %15 : vector<1x72x128xbf16> to vector<72x128xbf16>
    %cst_20 = arith.constant dense<0.000000e+00> : vector<8x128xf32>
    %17 = tpu.matmul %14, %16, %cst_20 {dimension_numbers = #tpu.dot_dimension_numbers<[1], [0], [0], [1], [0, 0, 1, 1], [], []>} : vector<8x72xbf16>, vector<72x128xbf16>, vector<8x128xf32> -> vector<8x128xf32>
    %18 = arith.addf %12, %17 : vector<8x128xf32>
    %c0_21 = arith.constant 0 : index
    %c0_22 = arith.constant 0 : index
    %19 = vector.load %arg4[%c0_21, %c0_22] : memref<1x128xf32, #tpu.memory_space<vmem>>, vector<1x128xf32>
    %20 = vector.broadcast %19 : vector<1x128xf32> to vector<8x128xf32>
    %21 = arith.addf %18, %20 : vector<8x128xf32>
    %cst_23 = arith.constant 0.000000e+00 : f32
    %22 = vector.broadcast %cst_23 : f32 to vector<8x128xf32>
    %23 = arith.maximumf %21, %22 : vector<8x128xf32>
    %24 = vector.shape_cast %23 : vector<8x128xf32> to vector<1x1x8x128xf32>
    %c0_24 = arith.constant 0 : index
    %c0_25 = arith.constant 0 : index
    %c0_26 = arith.constant 0 : index
    %c0_27 = arith.constant 0 : index
    %25 = vector.load %arg5[%c0_24, %c0_25, %c0_26, %c0_27] : memref<1x1x8x128xf32, #tpu.memory_space<vmem>>, vector<1x1x8x128xf32>
    tpu.vector_store %arg5[%c0_24, %c0_25, %c0_26, %c0_27], %24 {strides = array<i32>} : memref<1x1x8x128xf32, #tpu.memory_space<vmem>>, vector<1x1x8x128xf32>,
    return
  }
  func.func @transform_0(%arg0: i32, %arg1: i32) -> (i32, i32, i32, i32) {
    %c0_i32 = arith.constant 0 : i32
    %c0_i32_0 = arith.constant 0 : i32
    %c0_i32_1 = arith.constant 0 : i32
    return %arg0, %arg1, %c0_i32, %c0_i32_0 : i32, i32, i32, i32
  }
  func.func @transform_1(%arg0: i32, %arg1: i32) -> (i32, i32, i32) {
    %c0_i32 = arith.constant 0 : i32
    %c0_i32_0 = arith.constant 0 : i32
    %c0_i32_1 = arith.constant 0 : i32
    %c0_i32_2 = arith.constant 0 : i32
    return %c0_i32, %c0_i32_0, %c0_i32_1 : i32, i32, i32
  }
  func.func @transform_2(%arg0: i32, %arg1: i32) -> (i32, i32) {
    %c0_i32 = arith.constant 0 : i32
    %c0_i32_0 = arith.constant 0 : i32
    %c0_i32_1 = arith.constant 0 : i32
    return %c0_i32, %c0_i32_0 : i32, i32
  }
  func.func @transform_3(%arg0: i32, %arg1: i32) -> (i32, i32, i32, i32) {
    %c0_i32 = arith.constant 0 : i32
    %c0_i32_0 = arith.constant 0 : i32
    %c0_i32_1 = arith.constant 0 : i32
    return %arg0, %arg1, %c0_i32, %c0_i32_0 : i32, i32, i32, i32
  }
}

</mosaic_0001>

<bundles_post_ra>
// kernel: tpu_custom_call.1
= control target key start
LH: loop header
LB: loop body
LE: loop exit
PB: predicated region body
PF: predicated region fallthrough
CT: control target
= control target key end

     0   :  { %8 = vsyncpa [#allocation3], 0  ;;  %s985_s0 = inlined_call_operand.vmem [shape: bf16[2,2,10,72], index: 0, kind: input, shape index: {}]   ;;  %s986_s1 = inlined_call_operand.hbm [shape: bf16[3,72,128], index: 1, kind: input, shape index: {}]   ;;  %s987_s2 = inlined_call_operand.vmem [shape: f32[1,128], index: 2, kind: input, shape index: {}]   ;;  %s988_s3 = inlined_call_operand.hbm [shape: f32[2,2,8,128], index: 3, kind: output, shape index: {}]  }
   0x1   :  { %9 = vsyncpa [#allocation4], 0 }
   0x2   :  { %11 = vsyncpa [#allocation4 + $0x1], 0  ;;  %s839_s12 = smov 0   ;;  %s841_s13 = smov 0  }
   0x3   :  { %s843_s14 = smov 0   ;;  %s845_s15 = smov 0  }
   0x4   :  { %s847_s16 = smov 0   ;;  %s849_s17 = smov 0  }
   0x5   :  { %s851_s18 = smov 0   ;;  %s853_s19 = smov 0  }
   0x6 LB: > { %s522_s20 = sadd.s32 4294967295, %s814_s19   ;;  %s523_s21 = sadd.s32 4294967294, %s814_s19   ;;  %s814_s19 = sphi %s853_s19, %s17_s19   ;;  %s810_s18 = sphi %s851_s18, %s999_s18   ;;  %s806_s17 = sphi %s849_s17, %s998_s17   ;;  %s802_s16 = sphi %s847_s16, %s997_s16   ;;  %s798_s15 = sphi %s845_s15, %s996_s15   ;;  %s794_s14 = sphi %s843_s14, %s995_s14   ;;  %s790_s13 = sphi %s841_s13, %s994_s13   ;;  %s786_s12 = sphi %s839_s12, %s993_s12  }
   0x7   : > { %s26_s22 = sadd.s32 1, %s806_s17  ;;  %s29_s23 = sadd.s32 1, %s810_s18 }
   0x8   : > { %p27_p0 = scmp.ge.s32.totalorder %s26_s22, 2  ;;  %s108_s24 = sadd.s32 1, %s794_s14 }
   0x9   : > { %p118_p1 = scmp.ne.s32.totalorder %s794_s14, %s790_s13  ;;  %p119_p2 = scmp.eq.s32.totalorder %s522_s20, 3 }
   0xa   : > { %s1001_s22 = smov (%p27_p0, %s26_s22), 0  ;;  %s1003_s23 = smov (!%p27_p0, %s29_s23), %s810_s18 }
   0xb   : > { %s104_s25 = ssub.s32 %s806_s17, %s1001_s22  ;;  %p891_p3 = por %p119_p2, %p118_p1 }
   0xc   : > { %p31_p4 = scmp.ge.s32.totalorder %s1003_s23, 2  ;;  %p124_p5 = scmp.ne.s32.totalorder %s790_s13, %s786_s12 }
   0xd   : > { %p125_p6 = scmp.eq.s32.totalorder %s523_s21, 3  ;;  %p524_p7 = scmp.ge.s32.totalorder %s814_s19, 1 }
   0xe   : > { %s1005_s23 = smov (%p31_p4, %s1003_s23), 0  ;;  %p132_p9 = scmp.lt.s32.totalorder %s814_s19, 5 }
   0xf   : > { %p900_p8 = por %p125_p6, %p124_p5  ;;  %s103_s28 = ssub.s32 %s810_s18, %s1005_s23 }
  0x10   : > { %s105_s29 = sor.u32 %s104_s25, %s103_s28  ;;  %p907_p10 = pnand %p524_p7, %p132_p9 }
  0x11   : > { %p106_p11 = scmp.eq.s32.totalorder %s105_s29, 0  ;;  %p911_p12 = scmp.eq.s32.totalorder %s522_s20, 0 }
  0x12   : > { %p607_p13 = pneg %p907_p10  ;;  %s143_s7 = sshll.u32 %s986_s1, 4  ;;  %s144_s7 = int_to_ptr.hbm [resolvable:$true] %s143_s7 }
  0x13   : > { %s921_s8 = scalar_select %p106_p11, %s794_s14, %s108_s24  }
  0x14   : > { %s816_s9 = smov [#allocation2]   ;;  %p608_p0 = pnand %p911_p12, %p607_p13 }
  0x15   : > { %s145_s10 = sshll.u32 %s816_s9, 4  ;;  %s817_s11 = smov 64   ;;  %s146_s10 = int_to_ptr.vmem [resolvable:$true] %s145_s10 }
  0x16   : > { %s818_s20 = smov 4   ;;  %176 = sbr.rel (%p907_p10) target bundleno = 196 (0xc4), region = 32 }
  0x17   : > { %610 = dma.hbm_to_vmem [thread:$0]  (!%p608_p0), %s144_s7, 1728, %s146_s10, [#allocation3], %s817_s11, %s817_s11, %s818_s20  }
  0x1b   : > { %777 = dma.done.wait (%p911_p12), [#allocation3], 1728  }
  0x1c   : > { %779 = vsyncadd (%p911_p12), [#allocation3], 4294965568  ;;  %p205_p1 = scmp.lt.s32.totalorder %s802_s16, 1  ;;  %p207_p2 = scmp.lt.s32.totalorder %s798_s15, 1  ;;  %v235_v0 = vld [vmem:[#allocation2 + $0x44] sm:$0xf] }
  0x1d   : > { %v224_v1 = vld [vmem:[#allocation2 + $0x20] sm:$0xf]  ;;  %v352_v2 = vld [vmem:[#allocation2 + $0x68] sm:$0xf]  ;;  %v265_v3 = vunpack.c.l.b16 %v235_v0  ;;  %vm279_vm0 = vcmask 1043456   ;;  %v592_v14 = vld [vmem:[#allocation2 + $0x18] sm:$0xff] }
  0x1e   : > { %s206_s21 = scalar_select %p205_p1, %s802_s16, 1  ;;  %v313_v4 = vunpack.c.l.b16 %v224_v1  ;;  %v374_v5 = vunpack.c.l.b16 %v352_v2  ;;  %v596_v12 = vld [vmem:[#allocation2 + $0x3c] sm:$0xff]  ;;  %v595_v20 = vld [vmem:[#allocation2 + $0x34] sm:$0xff]  ;;  %v594_v25 = vld [vmem:[#allocation2 + $0x2c] sm:$0xff]  ;;  %vm275_vm1 = vcmask 588800  }
  0x1f   : > { %s208_s24 = scalar_select %p207_p2, %s798_s15, 1  ;;  %v270_v6 = vpack.c.b16 %v265_v3, %v265_v3  ;;  %v600_v17 = vld [vmem:[#allocation2 + $0x60] sm:$0xff]  ;;  %v591_v21 = vld [vmem:[#allocation2 + $0x10] sm:$0xff]  ;;  %v599_v22 = vld [vmem:[#allocation2 + $0x58] sm:$0xff] }
  0x20   : > { %s531_s25 = sshll.u32 %s206_s21, 2  ;;  %v318_v7 = vpack.c.b16 %v313_v4, %v313_v4  ;;  %v379_v8 = vpack.c.b16 %v374_v5, %v374_v5  ;;  %v590_v26 = vld [vmem:[#allocation2 + $0x8] sm:$0xff]  ;;  %v598_v28 = vld [vmem:[#allocation2 + $0x50] sm:$0xff]  ;;  %v589_v32 = vld [vmem:[#allocation2] sm:$0xff]  ;;  %s585_s7 = sshll.u32 %s802_s16, 1 }
  0x21   : > { %s530_s28 = sshll.u32 %s208_s24, 1  ;;  %v281_v9 = vsel %vm279_vm0, %v270_v6, 0  ;;  %v593_v31 = vld [vmem:[#allocation2 + $0x24] sm:$0xff]  ;;  %s202_s9 = sand.u32 1, %s790_s13   ;;  %v685_v40 = vld [vmem:[%s987_s2] ss:$0 sm:$0xff] }
  0x22   : > { %s211_s29 = sadd.s32 %s531_s25, %s530_s28  ;;  %v327_v10 = vsel %vm279_vm0, %v318_v7, 0  ;;  %v388_v11 = vsel %vm279_vm0, %v379_v8, 0  ;;  %286 = vmatpush.bf16.msra.mxu0 %v281_v9  ;;  %v597_v34 = vld [vmem:[#allocation2 + $0x48] sm:$0xff]  ;;  %s422_s10 = sadd.s32 %s798_s15, %s585_s7 }
  0x23   : > { %s532_s30 = sshll.u32 %s211_s29, 2  ;;  %332 = vmatpush.bf16.msra.mxu1 %v327_v10  ;;  %393 = vmatpush.bf16.msra.mxu2 %v388_v11  ;;  %s529_s11 = sshll.u32 %s202_s9, 3 }
  0x24   : > { %s213_s6 = scalar_lea.vmem %s985_s0, %s532_s30  ;;  %s586_s20 = sshll.u32 %s422_s10, 3 }
  0x25   : > { %v215_v13 = vld [vmem:[%s213_s6] sm:$0xf]  ;;  %v225_v15 = vld [vmem:[%s213_s6 + $0x4] sm:$0x1]  ;;  %s424_s29 = scalar_lea.hbm %s988_s3, %s586_s20  ;;  %s204_s16 = scalar_lea.vmem [#allocation5], %s529_s11 }
  0x26   : > { %v238_v16 = vunpack.c.l.b16 %v215_v13  ;;  %v239_v18 = vunpack.c.l.b16 %v225_v15  ;;  %287 = vmatpush.bf16.msra.mxu0 %v596_v12  ;;  %v342_v23 = vld [vmem:[%s213_s6] sm:$0xe]  ;;  %s426_s30 = sshll.u32 %s204_s16, 4  ;;  %s428_s4 = sshll.u32 %s424_s29, 4  ;;  %s427_s30 = int_to_ptr.vmem [resolvable:$true] %s426_s30  ;;  %s429_s4 = int_to_ptr.hbm [resolvable:$true] %s428_s4 }
  0x27   : > { %333 = vmatpush.bf16.msra.mxu1 %v592_v14  ;;  %394 = vmatpush.bf16.msra.mxu2 %v600_v17  ;;  %v354_v27 = vunpack.c.l.b16 %v342_v23  ;;  %s412_s15 = scalar_lea.sflag [#allocation4], %s202_s9  ;;  %s730_s5 = sshra.s32 %s429_s4, 4  ;;  %s731_s5 = int_to_ptr.hbm [resolvable:$true] %s730_s5 }
  0x28   : > { %v240_v19 = vpack.c.b16 %v239_v18, %v238_v16  ;;  %s732_s6 = scalar_lea.hbm %s731_s5, 8  ;;  %s736_s11 = scalar_lea.hbm %s988_s3, 32 }
  0x29   : > { %v355_v33 = vpack.c.b16 %v239_v18, %v354_v27  ;;  %p733_p4 = scmp.ne.s32.totalorder %s731_s5, %s732_s6  ;;  %p737_p7 = scmp.lt.s32.totalorder %s731_s5, %s988_s3 }
  0x2a   : > { %v244_v24 = vshll.u32 %v240_v19, 16  ;;  %288 = vmatpush.bf16.msra.mxu0 %v595_v20  ;;  %v242_v29 = vshrl.u32 %v240_v19, 16  ;;  %p738_p9 = scmp.lt.s32.totalorder %s736_s11, %s732_s6 }
  0x2b   : > { %334 = vmatpush.bf16.msra.mxu1 %v591_v21  ;;  %395 = vmatpush.bf16.msra.mxu2 %v599_v22  ;;  %v356_v36 = vrot.slane %v355_v33, 1  ;;  %p734_p5 = pnand %p733_p4, %p891_p3 }
  0x2c   : > { %v246_v30 = vrot.slane %v244_v24, 1  ;;  %p739_p10 = por %p738_p9, %p737_p7 }
  0x2d   : > { %p735_p6 = pneg %p734_p5 }
  0x2e   : > { %289 = vmatpush.bf16.msra.mxu0 %v594_v25  ;;  %v247_v35 = vor.u32 %v246_v30, %v242_v29 }
  0x2f   : > { %335 = vmatpush.bf16.msra.mxu1 %v590_v26  ;;  %396 = vmatpush.bf16.msra.mxu2 %v598_v28  ;;  %p740_p11 = pnand %p739_p10, %p735_p6 }
  0x32   : > { %290 = vmatpush.bf16.msra.mxu0 %v593_v31 }
  0x33   : > { %336 = vmatpush.bf16.msra.mxu1 %v589_v32  ;;  %397 = vmatpush.bf16.msra.mxu2 %v597_v34 }
  0x35   : > { %549 = vmatmul.msk.bf16.vlgmr.msra.gmra.mxu0 %vm275_vm1, %v247_v35 }
  0x36   : > { %566 = vmatmul.msk.bf16.vlgmr.msra.gmra.mxu1 %vm275_vm1, %v215_v13  ;;  %583 = vmatmul.msk.bf16.vlgmr.msra.gmra.mxu2 %vm275_vm1, %v356_v36 }
  0xb2   : > { %v292_v37 = vpop.f32.mrf.mxu0 }
  0xb3   : > { %v338_v38 = vpop.f32.mrf.mxu1 }
  0xb4   : > { %v339_v39 = vadd.f32 %v338_v38, %v292_v37 }
  0xb9   : > { %v399_v41 = vpop.f32.mrf.mxu2 }
  0xba   : > { %v403_v42 = vadd.f32 %v399_v41, %v339_v39  ;;  %v294_v43 = vpop.f32.mrf.mxu0 }
  0xbb   : > { %v340_v44 = vpop.f32.mrf.mxu1 }
  0xbc   : > { %v408_v45 = vadd.f32 %v685_v40, %v403_v42 }
  0xbe   : > { %v409_v46 = vmax.f32 %v408_v45, 0.0 }
  0xc0   : > { %410 = vst [vmem:[%s204_s16] sm:$0xff] %v409_v46 }
  0xc1   : > { %v401_v47 = vpop.f32.mrf.mxu2 }
  0xc2   : > { %743 = shalt.err (!%p740_p11)
}
  0xc3   : > { %605 = dma.vmem_to_hbm [thread:$0]  (%p891_p3), %s427_s30, 128, %s429_s4, %s412_s15  }
  0xc4 PF: > { %p617_p12 = scmp.ge.s32.totalorder %s814_s19, 2  ;;  %s440_s9 = sand.u32 1, %s786_s12  }
  0xc5   : > { %s441_s24 = scalar_lea.sflag [#allocation4], %s440_s9 }
  0xc6   : > { %p612_p13 = pnand %p617_p12, %p900_p8 }
  0xc8   : > { %p613_p0 = pneg %p612_p13 }
  0xca   : > { %781 = dma.done.wait (%p613_p0), %s441_s24, 128  }
  0xcb   : > { %783 = vsyncadd (%p613_p0), %s441_s24, 4294967168  ;;  %s17_s19 = sadd.s32 1, %s814_s19   ;;  %s993_s12 = smov %s790_s13 }
  0xcc   : > { %p14_p1 = scmp.ge.s32.totalorder %s17_s19, 6   ;;  %s994_s13 = smov %s794_s14 }
  0xcd   : > { %s995_s14 = smov %s921_s8  ;;  %s996_s15 = smov %s806_s17 }
  0xce   : > { %s997_s16 = smov %s810_s18  ;;  %s998_s17 = smov %s1001_s22 }
  0xcf   : > { %s999_s18 = smov %s1005_s23  ;;  %16 = sbr.rel (!%p14_p1) target bundleno = 6 (0x6), region = 74 }
  0xd4   :  { %447 = vsyncpa [#allocation3], 1 }
  0xd5   :  { %449 = vsyncpa [#allocation3 + $0x1], 1 }
  0xd6   :  { %450 = vsyncpa [#allocation4], 1 }
  0xd7   :  { %452 = vsyncpa [#allocation4 + $0x1], 1 }

</bundles_post_ra>
